<compile_context>
chip_gen: v7x
topology: tpu7x:2x2x1
jax: 0.10.0
libtpu: 0.0.40
codegen_flags: <defaults>
</compile_context>

<pallas_src>
import jax
import jax.numpy as jnp
from jax.experimental import pallas as pl
from jax.experimental.pallas import tpu as pltpu

EPS = 1e-6


def _round_up(x, m):
    return ((x + m - 1) // m) * m


def _tpu_vmem_info():
    """(physical per-core VMEM bytes, likely-two-TensorCores?) with safe fallback."""
    phys = 64 * 2**20  # conservative fallback (v7x-sized)
    try:
        phys = int(pltpu.get_tpu_info().vmem_capacity_bytes)
    except Exception:
        pass
    # v7x is the generation with 64 MiB/TC and 2 TensorCores per chip.
    two_cores = phys <= 64 * 2**20
    return phys, two_cores


def _vmem_need(tm, ti, H, w_bytes):
    """Estimated VMEM working set for a (tm, ti) tile plan (bytes)."""
    act = 2 * 2 * tm * H * w_bytes              # x + out tiles, double-buffered (bf16)
    wts = 2 * (2 * ti * H + ti * H) * w_bytes   # fused gate|up slab + down, double-buffered
    scr = tm * H * (w_bytes + 4)                # xn (bf16) scratch + f32 accumulator
    tmp = 4 * tm * ti * 4                       # g/u/h f32 intermediates (compiler temporaries)
    return act + wts + scr + tmp + (2 << 20)    # + Mosaic internal-scratch headroom


def _pick_tiles(T, H, I, budget, w_bytes):
    """Largest (tm, ti) that fits the VMEM budget; tm multiple of 16, ti of 128."""
    tm_max = _round_up(max(T, 1), 16)
    ti_max = _round_up(max(I, 1), 128)
    tm_cands = sorted(
        {c for c in (512, 384, 256, 128, 64, 32, 16) if c <= tm_max}
        | ({tm_max} if tm_max <= 512 else set()),
        reverse=True) or [tm_max]
    ti_cands = [c for c in (512, 256, 128) if c <= ti_max] or [ti_max]
    for tm in tm_cands:            # prefer big tm (arithmetic intensity) ...
        for ti in ti_cands:        # ... then big ti (MXU / per-step overhead)
            need = _vmem_need(tm, ti, H, w_bytes)
            if need <= budget:
                return tm, ti, need
    tm, ti = tm_cands[-1], ti_cands[-1]
    return tm, ti, _vmem_need(tm, ti, H, w_bytes)


def _mlp_kernel(x_ref, gu_ref, down_ref, o_ref, xn_ref, acc_ref):
    # grid = (token_tiles, i_tiles); the intermediate axis j is the inner,
    # sequential reduction axis for the down projection.
    j = pl.program_id(1)

    @pl.when(j == 0)
    def _():
        # RMSNorm in f32 (LlamaRMSNorm). The ln scale is already folded into
        # the gate/up weights by the wrapper. Computed once per token tile.
        x = x_ref[...].astype(jnp.float32)                    # (tm, H)
        var = jnp.mean(x * x, axis=-1, keepdims=True)         # (tm, 1)
        xn = x * jax.lax.rsqrt(var + EPS)                     # (tm, H)
        xn_ref[...] = xn.astype(xn_ref.dtype)                 # cache in bf16
        acc_ref[...] = jnp.zeros_like(acc_ref)

    xn = xn_ref[...]                                          # (tm, H) bf16
    # One fused MXU matmul for gate+up against the interleaved (H, 2*ti) slab,
    # bf16 operands with f32 accumulation.
    gu = jnp.dot(xn, gu_ref[...], preferred_element_type=jnp.float32)  # (tm, 2*ti)
    ti = gu.shape[-1] // 2
    g = gu[:, :ti]
    u = gu[:, ti:]
    h = (g * jax.nn.sigmoid(g)) * u                           # SiLU(gate) * up, f32
    acc_ref[...] += jnp.dot(h.astype(down_ref.dtype), down_ref[...],
                            preferred_element_type=jnp.float32)         # (tm, H)

    @pl.when(j == pl.num_programs(1) - 1)
    def _():
        o_ref[...] = acc_ref[...].astype(o_ref.dtype)


def baseline_net(x, ln_weight, w_gate, w_up, w_down, *, compute_dtype=jnp.bfloat16):
    """x: (B, S, H) -> (B, S, H).

    ln_weight: (H,)   w_gate/w_up: (H, I)   w_down: (I, H)
    (weights stored as [in_features, out_features], i.e. nn.Linear weight.T)
    """
    B, S, H = x.shape
    I = w_gate.shape[1]
    T = B * S
    w_bytes = jnp.dtype(compute_dtype).itemsize

    # Generation-aware VMEM budget: ~78% of physical per-core VMEM
    # (≈100 MiB on v5e/v6e, ≈50 MiB on v7x; never the full 64 MiB on v7x).
    phys_vmem, two_cores = _tpu_vmem_info()
    budget = int(phys_vmem * 0.78)
    tm, ti, vmem_need = _pick_tiles(T, H, I, budget, w_bytes)

    # Token-tile count; on v7x pad to an even tile count so the "parallel"
    # token axis splits evenly over the two TensorCores.
    n_tok = -(-T // tm)
    if two_cores and n_tok > 1 and (n_tok % 2):
        n_tok += 1
    T_pad = n_tok * tm
    n_it = -(-I // ti)
    I_pad = n_it * ti

    # Fold the RMSNorm scale into gate/up projections (exact, done once, f32),
    # then cast weights to bf16 for MXU-native matmuls.
    lw = ln_weight.astype(jnp.float32).reshape(H, 1)
    wg = (lw * w_gate.astype(jnp.float32)).astype(compute_dtype)
    wu = (lw * w_up.astype(jnp.float32)).astype(compute_dtype)
    wd = w_down.astype(compute_dtype)

    if I_pad != I:
        # zero-padded I columns/rows contribute exactly 0 to the output.
        wg = jnp.pad(wg, ((0, 0), (0, I_pad - I)))
        wu = jnp.pad(wu, ((0, 0), (0, I_pad - I)))
        wd = jnp.pad(wd, ((0, I_pad - I), (0, 0)))

    # Tile-blocked HBM weight layouts: one contiguous slab per grid step.
    #   fused gate|up: (n_it, H, 2*ti)     down: (n_it, ti, H)
    wg_b = wg.reshape(H, n_it, ti).transpose(1, 0, 2)
    wu_b = wu.reshape(H, n_it, ti).transpose(1, 0, 2)
    wgu = jnp.concatenate([wg_b, wu_b], axis=-1)
    wd_b = wd.reshape(n_it, ti, H)

    # bf16 activation I/O (halves x/out DMA bytes and buffer footprint).
    x2d = x.reshape(T, H).astype(compute_dtype)
    if T_pad != T:
        # zero padding is safe: var=0 rows stay finite and are sliced off.
        x2d = jnp.pad(x2d, ((0, T_pad - T), (0, 0)))

    grid = (n_tok, n_it)

    # Honest traffic estimate: weights are re-streamed once per token tile.
    bytes_accessed = int(
        T_pad * H * w_bytes * 2                       # x in + out
        + n_tok * (wgu.size + wd_b.size) * w_bytes)   # streamed weights
    cost = pl.CostEstimate(
        flops=6 * T_pad * H * I_pad,                  # three matmuls
        transcendentals=T_pad * I_pad + T_pad,        # sigmoid + rsqrt
        bytes_accessed=bytes_accessed)

    vmem_limit = int(min(budget, max(vmem_need, 32 * 2**20)))
    vmem_limit = max(vmem_limit, int(vmem_need))      # never request below the need

    out2d = pl.pallas_call(
        _mlp_kernel,
        out_shape=jax.ShapeDtypeStruct((T_pad, H), compute_dtype),
        grid_spec=pltpu.PrefetchScalarGridSpec(
            num_scalar_prefetch=0,
            grid=grid,
            in_specs=[
                pl.BlockSpec((tm, H), lambda i, j: (i, 0)),              # activations
                pl.BlockSpec((None, H, 2 * ti), lambda i, j: (j, 0, 0)),  # fused gate|up slab
                pl.BlockSpec((None, ti, H), lambda i, j: (j, 0, 0)),      # down slab
            ],
            out_specs=pl.BlockSpec((tm, H), lambda i, j: (i, 0)),
            scratch_shapes=[
                pltpu.VMEM((tm, H), compute_dtype),   # cached rmsnorm(x), bf16
                pltpu.VMEM((tm, H), jnp.float32),     # down-proj accumulator
            ],
        ),
        compiler_params=pltpu.CompilerParams(
            dimension_semantics=("parallel", "arbitrary"),
            vmem_limit_bytes=vmem_limit,
        ),
        cost_estimate=cost,
    )(x2d, wgu, wd_b)

    return out2d[:T].astype(x.dtype).reshape(B, S, H)


# ---------------------------------------------------------------------------
# References for correctness checking
# ---------------------------------------------------------------------------
def _reference_f32(x, ln_weight, w_gate, w_up, w_down):
    xf = x.astype(jnp.float32)
    var = jnp.mean(xf * xf, axis=-1, keepdims=True)
    xn = xf * jax.lax.rsqrt(var + EPS) * ln_weight.astype(jnp.float32)
    g = jnp.dot(xn, w_gate.astype(jnp.float32), preferred_element_type=jnp.float32)
    u = jnp.dot(xn, w_up.astype(jnp.float32), preferred_element_type=jnp.float32)
    h = (g * jax.nn.sigmoid(g)) * u
    y = jnp.dot(h, w_down.astype(jnp.float32), preferred_element_type=jnp.float32)
    return y.astype(x.dtype)


def _reference_matched(x, ln_weight, w_gate, w_up, w_down, compute_dtype=jnp.bfloat16):
    # Mirrors the kernel numerics: bf16 activation I/O, ln folded into bf16
    # weights, f32 RMSNorm math, bf16 MXU operands with f32 accumulation.
    H = x.shape[-1]
    lw = ln_weight.astype(jnp.float32).reshape(H, 1)
    wg = (lw * w_gate.astype(jnp.float32)).astype(compute_dtype)
    wu = (lw * w_up.astype(jnp.float32)).astype(compute_dtype)
    wd = w_down.astype(compute_dtype)
    xb = x.astype(compute_dtype).astype(jnp.float32)
    var = jnp.mean(xb * xb, axis=-1, keepdims=True)
    xn = (xb * jax.lax.rsqrt(var + EPS)).astype(compute_dtype)
    g = jnp.dot(xn, wg, preferred_element_type=jnp.float32)
    u = jnp.dot(xn, wu, preferred_element_type=jnp.float32)
    h = (g * jax.nn.sigmoid(g)) * u
    y = jnp.dot(h.astype(compute_dtype), wd, preferred_element_type=jnp.float32)
    return y.astype(compute_dtype).astype(x.dtype)


if __name__ == "__main__":
    # Small config: batch=2, seq=8, hidden=128, intermediate=256
    B, S, H, I = 2, 8, 128, 256
    key = jax.random.PRNGKey(0)
    kx, kl, kg, ku, kd = jax.random.split(key, 5)

    x = jax.random.normal(kx, (B, S, H), dtype=jnp.float32)
    ln_weight = 1.0 + 0.1 * jax.random.normal(kl, (H,), dtype=jnp.float32)
    w_gate = 0.02 * jax.random.normal(kg, (H, I), dtype=jnp.float32)
    w_up = 0.02 * jax.random.normal(ku, (H, I), dtype=jnp.float32)
    w_down = 0.02 * jax.random.normal(kd, (I, H), dtype=jnp.float32)

    out = jax.block_until_ready(baseline_net(x, ln_weight, w_gate, w_up, w_down))
    assert out.shape == (B, S, H)

    # Tight check against a reference with matched bf16 numerics.
    ref_m = _reference_matched(x, ln_weight, w_gate, w_up, w_down)
    assert jnp.allclose(out, ref_m, atol=2e-3, rtol=2e-3), \
        "mismatch vs bf16-matched reference"

    # Looser check against the pure f32 reference (bf16 quantization only).
    ref_f = _reference_f32(x, ln_weight, w_gate, w_up, w_down)
    assert jnp.allclose(out, ref_f, atol=3e-2, rtol=3e-2), \
        "mismatch vs f32 reference"

    print("KERNEL_OK")
</pallas_src>

<mosaic_0001>
module attributes {stable_mosaic.version = 11 : i64} {
  func.func @_mlp_kernel(%arg0: i32, %arg1: i32, %arg2: memref<16x128xbf16, #tpu.memory_space<vmem>>, %arg3: memref<1x128x512xbf16, #tpu.memory_space<vmem>>, %arg4: memref<1x256x128xbf16, #tpu.memory_space<vmem>>, %arg5: memref<16x128xbf16, #tpu.memory_space<vmem>>, %arg6: memref<16x128xbf16, #tpu.memory_space<vmem>>, %arg7: memref<16x128xf32, #tpu.memory_space<vmem>>) attributes {dimension_semantics = [#tpu.dimension_semantics<parallel>, #tpu.dimension_semantics<arbitrary>], iteration_bounds = array<i64: 1, 1>, scalar_prefetch = 0 : i64, scratch_operands = 2 : i64, tpu.core_type = #tpu.core_type<tc>, window_params = [{transform_indices = @transform_0, window_bounds = array<i64: 16, 128>}, {transform_indices = @transform_1, window_bounds = array<i64: 1, 128, 512>}, {transform_indices = @transform_2, window_bounds = array<i64: 1, 256, 128>}, {transform_indices = @transform_3, window_bounds = array<i64: 16, 128>}]} {
    %c0_i32 = arith.constant 0 : i32
    %0 = arith.cmpi eq, %arg1, %c0_i32 : i32
    %1 = arith.extui %0 : i1 to i32
    %c0_i32_0 = arith.constant 0 : i32
    %2 = arith.cmpi ne, %1, %c0_i32_0 : i32
    scf.if %2 {
      %c0_16 = arith.constant 0 : index
      %c0_17 = arith.constant 0 : index
      %26 = vector.load %arg2[%c0_16, %c0_17] : memref<16x128xbf16, #tpu.memory_space<vmem>>, vector<16x128xbf16>
      %27 = arith.extf %26 : vector<16x128xbf16> to vector<16x128xf32>
      %28 = arith.mulf %27, %27 : vector<16x128xf32>
      %cst_18 = arith.constant dense<0.000000e+00> : vector<16xf32>
      %29 = vector.multi_reduction <add>, %28, %cst_18 [1] : vector<16x128xf32> to vector<16xf32>
      %30 = vector.shape_cast %29 : vector<16xf32> to vector<16x1xf32>
      %cst_19 = arith.constant 1.280000e+02 : f32
      %31 = vector.broadcast %cst_19 : f32 to vector<16x1xf32>
      %32 = arith.divf %30, %31 : vector<16x1xf32>
      %cst_20 = arith.constant 9.99999997E-7 : f32
      %33 = vector.broadcast %cst_20 : f32 to vector<16x1xf32>
      %34 = arith.addf %32, %33 : vector<16x1xf32>
      %35 = math.rsqrt %34 : vector<16x1xf32>
      %36 = vector.broadcast %35 : vector<16x1xf32> to vector<16x128xf32>
      %37 = arith.mulf %27, %36 : vector<16x128xf32>
      %38 = arith.truncf %37 : vector<16x128xf32> to vector<16x128xbf16>
      %c0_21 = arith.constant 0 : index
      %c0_22 = arith.constant 0 : index
      %39 = vector.load %arg6[%c0_21, %c0_22] : memref<16x128xbf16, #tpu.memory_space<vmem>>, vector<16x128xbf16>
      tpu.vector_store %arg6[%c0_21, %c0_22], %38 {strides = array<i32>} : memref<16x128xbf16, #tpu.memory_space<vmem>>, vector<16x128xbf16>,
      %cst_23 = arith.constant 0.000000e+00 : f32
      %40 = vector.broadcast %cst_23 : f32 to vector<16x128xf32>
      %c0_24 = arith.constant 0 : index
      %c0_25 = arith.constant 0 : index
      %41 = vector.load %arg7[%c0_24, %c0_25] : memref<16x128xf32, #tpu.memory_space<vmem>>, vector<16x128xf32>
      tpu.vector_store %arg7[%c0_24, %c0_25], %40 {strides = array<i32>} : memref<16x128xf32, #tpu.memory_space<vmem>>, vector<16x128xf32>,
    } else {
    }
    %c0 = arith.constant 0 : index
    %c0_1 = arith.constant 0 : index
    %3 = vector.load %arg6[%c0, %c0_1] : memref<16x128xbf16, #tpu.memory_space<vmem>>, vector<16x128xbf16>
    %c0_2 = arith.constant 0 : index
    %c0_3 = arith.constant 0 : index
    %c0_4 = arith.constant 0 : index
    %4 = vector.load %arg3[%c0_2, %c0_3, %c0_4] : memref<1x128x512xbf16, #tpu.memory_space<vmem>>, vector<1x128x512xbf16>
    %5 = vector.shape_cast %4 : vector<1x128x512xbf16> to vector<128x512xbf16>
    %cst = arith.constant dense<0.000000e+00> : vector<16x512xf32>
    %6 = tpu.matmul %3, %5, %cst {dimension_numbers = #tpu.dot_dimension_numbers<[1], [0], [0], [1], [0, 0, 1, 1], [], []>} : vector<16x128xbf16>, vector<128x512xbf16>, vector<16x512xf32> -> vector<16x512xf32>
    %7 = vector.extract_strided_slice %6 {offsets = [0, 0], sizes = [16, 256], strides = [1, 1]} : vector<16x512xf32> to vector<16x256xf32>
    %8 = vector.extract_strided_slice %6 {offsets = [0, 256], sizes = [16, 256], strides = [1, 1]} : vector<16x512xf32> to vector<16x256xf32>
    %9 = arith.negf %7 : vector<16x256xf32>
    %10 = math.exp %9 : vector<16x256xf32>
    %cst_5 = arith.constant 1.000000e+00 : f32
    %11 = vector.broadcast %cst_5 : f32 to vector<16x256xf32>
    %12 = arith.addf %11, %10 : vector<16x256xf32>
    %13 = arith.divf %11, %12 : vector<16x256xf32>
    %14 = arith.mulf %7, %13 : vector<16x256xf32>
    %15 = arith.mulf %14, %8 : vector<16x256xf32>
    %c0_6 = arith.constant 0 : index
    %c0_7 = arith.constant 0 : index
    %16 = vector.load %arg7[%c0_6, %c0_7] : memref<16x128xf32, #tpu.memory_space<vmem>>, vector<16x128xf32>
    %17 = arith.truncf %15 : vector<16x256xf32> to vector<16x256xbf16>
    %c0_8 = arith.constant 0 : index
    %c0_9 = arith.constant 0 : index
    %c0_10 = arith.constant 0 : index
    %18 = vector.load %arg4[%c0_8, %c0_9, %c0_10] : memref<1x256x128xbf16, #tpu.memory_space<vmem>>, vector<1x256x128xbf16>
    %19 = vector.shape_cast %18 : vector<1x256x128xbf16> to vector<256x128xbf16>
    %cst_11 = arith.constant dense<0.000000e+00> : vector<16x128xf32>
    %20 = tpu.matmul %17, %19, %cst_11 {dimension_numbers = #tpu.dot_dimension_numbers<[1], [0], [0], [1], [0, 0, 1, 1], [], []>} : vector<16x256xbf16>, vector<256x128xbf16>, vector<16x128xf32> -> vector<16x128xf32>
    %21 = arith.addf %16, %20 : vector<16x128xf32>
    %c0_12 = arith.constant 0 : index
    %c0_13 = arith.constant 0 : index
    %22 = vector.load %arg7[%c0_12, %c0_13] : memref<16x128xf32, #tpu.memory_space<vmem>>, vector<16x128xf32>
    tpu.vector_store %arg7[%c0_12, %c0_13], %21 {strides = array<i32>} : memref<16x128xf32, #tpu.memory_space<vmem>>, vector<16x128xf32>,
    %c0_i32_14 = arith.constant 0 : i32
    %23 = arith.cmpi eq, %arg1, %c0_i32_14 : i32
    %24 = arith.extui %23 : i1 to i32
    %c0_i32_15 = arith.constant 0 : i32
    %25 = arith.cmpi ne, %24, %c0_i32_15 : i32
    scf.if %25 {
      %c0_16 = arith.constant 0 : index
      %c0_17 = arith.constant 0 : index
      %26 = vector.load %arg7[%c0_16, %c0_17] : memref<16x128xf32, #tpu.memory_space<vmem>>, vector<16x128xf32>
      %27 = arith.truncf %26 : vector<16x128xf32> to vector<16x128xbf16>
      %c0_18 = arith.constant 0 : index
      %c0_19 = arith.constant 0 : index
      %28 = vector.load %arg5[%c0_18, %c0_19] : memref<16x128xbf16, #tpu.memory_space<vmem>>, vector<16x128xbf16>
      tpu.vector_store %arg5[%c0_18, %c0_19], %27 {strides = array<i32>} : memref<16x128xbf16, #tpu.memory_space<vmem>>, vector<16x128xbf16>,
    } else {
    }
    return
  }
  func.func @transform_0(%arg0: i32, %arg1: i32) -> (i32, i32) {
    %c0_i32 = arith.constant 0 : i32
    %c0_i32_0 = arith.constant 0 : i32
    return %arg0, %c0_i32 : i32, i32
  }
  func.func @transform_1(%arg0: i32, %arg1: i32) -> (i32, i32, i32) {
    %c0_i32 = arith.constant 0 : i32
    %c0_i32_0 = arith.constant 0 : i32
    %c0_i32_1 = arith.constant 0 : i32
    return %arg1, %c0_i32, %c0_i32_0 : i32, i32, i32
  }
  func.func @transform_2(%arg0: i32, %arg1: i32) -> (i32, i32, i32) {
    %c0_i32 = arith.constant 0 : i32
    %c0_i32_0 = arith.constant 0 : i32
    %c0_i32_1 = arith.constant 0 : i32
    return %arg1, %c0_i32, %c0_i32_0 : i32, i32, i32
  }
  func.func @transform_3(%arg0: i32, %arg1: i32) -> (i32, i32) {
    %c0_i32 = arith.constant 0 : i32
    %c0_i32_0 = arith.constant 0 : i32
    return %arg0, %c0_i32 : i32, i32
  }
}

</mosaic_0001>

<bundles_post_ra>
// kernel: tpu_custom_call.1
= control target key start
LH: loop header
LB: loop body
LE: loop exit
PB: predicated region body
PF: predicated region fallthrough
CT: control target
= control target key end

     0   :  { %8 = vsyncpa [#allocation5], 0  ;;  %s975_s0 = inlined_call_operand.hbm [shape: bf16[16,128], index: 0, kind: input, shape index: {}]   ;;  %s976_s1 = inlined_call_operand.hbm [shape: bf16[1,128,512], index: 1, kind: input, shape index: {}]   ;;  %s977_s2 = inlined_call_operand.hbm [shape: bf16[1,256,128], index: 2, kind: input, shape index: {}]   ;;  %s978_s3 = inlined_call_operand.hbm [shape: bf16[16,128], index: 3, kind: output, shape index: {}]  }
   0x1   :  { %9 = vsyncpa [#allocation8], 0 }
   0x2   :  { %10 = vsyncpa [#allocation6], 0  ;;  %s879_s12 = smov [#allocation7]   ;;  %s785_s16 = scalar_lea.hbm %s976_s1, 4096 }
   0x3   :  { %s28_s13 = sshll.u32 %s879_s12, 4  ;;  %p786_p0 = scmp.ne.s32.totalorder %s976_s1, %s785_s16  ;;  %s29_s13 = int_to_ptr.vmem [resolvable:$true] %s28_s13 }
   0x4   :  { %p789_p1 = scmp.lt.u32.totalorder %s785_s16, %s976_s1 }
   0x6   :  { %p791_p2 = pnand %p789_p1, %p786_p0 }
   0x8   :  { %794 = shalt.err (!%p791_p2)
}
   0x9   :  { %s795_s21 = scalar_lea.vmem %s29_s13, 4096  ;;  %p800_p4 = scmp.lt.s32.totalorder %s29_s13, %s29_s13 }
   0xa   :  { %p796_p3 = scmp.ne.s32.totalorder %s29_s13, %s795_s21  ;;  %p801_p5 = scmp.lt.s32.totalorder %s795_s21, %s795_s21 }
   0xc   :  { %p802_p6 = por %p801_p5, %p800_p4 }
   0xe   :  { %p803_p7 = pnand %p802_p6, %p796_p3 }
  0x10   :  { %806 = shalt.err (!%p803_p7)
}
  0x11   :  { %s880_s22 = smov 256   ;;  %s881_s23 = smov 16  }
  0x12   :  { %34 = dma.hbm_to_vmem [thread:$0]  %s976_s1, 4096, %s29_s13, [#allocation8], %s880_s22, %s880_s22, %s881_s23  }
  0x13   :  { %s882_s26 = smov [#allocation4]   ;;  %s807_s30 = scalar_lea.hbm %s975_s0, 128 }
  0x14   :  { %s16_s27 = sshll.u32 %s882_s26, 4  ;;  %p808_p8 = scmp.ne.s32.totalorder %s975_s0, %s807_s30  ;;  %s17_s27 = int_to_ptr.vmem [resolvable:$true] %s16_s27 }
  0x15   :  { %p811_p9 = scmp.lt.u32.totalorder %s807_s30, %s975_s0 }
  0x17   :  { %p813_p10 = pnand %p811_p9, %p808_p8 }
  0x19   :  { %816 = shalt.err (!%p813_p10)
}
  0x1a   :  { %s817_s8 = scalar_lea.vmem %s17_s27, 128  ;;  %p822_p12 = scmp.lt.s32.totalorder %s17_s27, %s17_s27 }
  0x1b   :  { %p818_p11 = scmp.ne.s32.totalorder %s17_s27, %s817_s8  ;;  %p823_p13 = scmp.lt.s32.totalorder %s817_s8, %s817_s8 }
  0x1d   :  { %p824_p0 = por %p823_p13, %p822_p12 }
  0x1f   :  { %p825_p1 = pnand %p824_p0, %p818_p11 }
  0x21   :  { %828 = shalt.err (!%p825_p1)
}
  0x22   :  { %s883_s1 = smov 64   ;;  %s884_s9 = smov 4  }
  0x23   :  { %22 = dma.hbm_to_vmem [thread:$0]  %s975_s0, 128, %s17_s27, [#allocation5], %s883_s1, %s883_s1, %s884_s9  }
  0x24   :  { %s885_s12 = smov [#allocation9]   ;;  %s829_s16 = scalar_lea.hbm %s977_s2, 2048 }
  0x25   :  { %s40_s13 = sshll.u32 %s885_s12, 4  ;;  %p830_p2 = scmp.ne.s32.totalorder %s977_s2, %s829_s16  ;;  %s41_s13 = int_to_ptr.vmem [resolvable:$true] %s40_s13 }
  0x26   :  { %p833_p3 = scmp.lt.u32.totalorder %s829_s16, %s977_s2 }
  0x28   :  { %p835_p4 = pnand %p833_p3, %p830_p2 }
  0x2a   :  { %838 = shalt.err (!%p835_p4)
}
  0x2b   :  { %s839_s21 = scalar_lea.vmem %s41_s13, 2048  ;;  %p844_p6 = scmp.lt.s32.totalorder %s41_s13, %s41_s13 }
  0x2c   :  { %p840_p5 = scmp.ne.s32.totalorder %s41_s13, %s839_s21  ;;  %p845_p7 = scmp.lt.s32.totalorder %s839_s21, %s839_s21 }
  0x2e   :  { %p846_p8 = por %p845_p7, %p844_p6 }
  0x30   :  { %p847_p9 = pnand %p846_p8, %p840_p5 }
  0x32   :  { %850 = shalt.err (!%p847_p9)
}
  0x33   :  { %46 = dma.hbm_to_vmem [thread:$0]  %s977_s2, 2048, %s41_s13, [#allocation8], %s883_s1, %s883_s1, %s884_s9  }
  0x34   :  { %873 = dma.done.wait [#allocation5], 128  }
  0x35   :  { %874 = vsyncadd [#allocation5], 4294967168 }
  0x36   :  { %875 = dma.done.wait [#allocation8], 6144  }
  0x37   :  { %876 = vsyncadd [#allocation8], 4294961152  ;;  %v662_v0 = vld [vmem:[#allocation4] sm:$0xff]   ;;  %v701_v3 = vld [vmem:[#allocation7 + $0x4] ss:$16 sps:$4 sm:$0xff]   ;;  %v886_v35 = vmov 0  }
  0x38   :  { %v950_v1 = vunpack.c.l.bf16 %v662_v0  ;;  %v952_v2 = vunpack.c.h.bf16 %v662_v0  ;;  %v703_v4 = vld [vmem:[#allocation7 + $0xc] ss:$16 sps:$4 sm:$0xff]   ;;  %v705_v5 = vld [vmem:[#allocation7] ss:$16 sps:$4 sm:$0xff]   ;;  %v706_v6 = vld [vmem:[#allocation7 + $0x8] ss:$16 sps:$4 sm:$0xff]   ;;  %277 = vmatprep.subr.bf16.mxu0 %v701_v3  ;;  %309 = vmatprep.mubr.bf16.mxu0 %v886_v35 }
  0x39   :  { %v707_v8 = vld [vmem:[#allocation7 + $0x24] ss:$16 sps:$4 sm:$0xff]   ;;  %320 = vmatprep.subr.bf16.mxu1 %v703_v4  ;;  %278 = vmatpush1.bf16.msra.mxu0 %v705_v5  ;;  %v709_v9 = vld [vmem:[#allocation7 + $0x2c] ss:$16 sps:$4 sm:$0xff]   ;;  %v711_v11 = vld [vmem:[#allocation7 + $0x20] ss:$16 sps:$4 sm:$0xff]  }
  0x3a   :  { %v65_v7 = vmul.f32 %v950_v1, %v950_v1  ;;  %v66_v10 = vmul.f32 %v952_v2, %v952_v2  ;;  %321 = vmatpush1.bf16.msra.mxu1 %v706_v6  ;;  %v712_v12 = vld [vmem:[#allocation7 + $0x28] ss:$16 sps:$4 sm:$0xff]   ;;  %279 = vmatprep.subr.bf16.mxu0 %v707_v8  ;;  %v713_v13 = vld [vmem:[#allocation7 + $0x44] ss:$16 sps:$4 sm:$0xff]   ;;  %v715_v14 = vld [vmem:[#allocation7 + $0x4c] ss:$16 sps:$4 sm:$0xff]  }
  0x3b   :  { %322 = vmatprep.subr.bf16.mxu1 %v709_v9  ;;  %v717_v15 = vld [vmem:[#allocation7 + $0x40] ss:$16 sps:$4 sm:$0xff]   ;;  %v718_v16 = vld [vmem:[#allocation7 + $0x48] ss:$16 sps:$4 sm:$0xff]   ;;  %v719_v17 = vld [vmem:[#allocation7 + $0x64] ss:$16 sps:$4 sm:$0xff]   ;;  %352 = vmatprep.mubr.bf16.mxu1 %v886_v35 }
  0x3c   :  { %67 = vadd.xlane.f32.xlu0 %v65_v7  ;;  %v721_v18 = vld [vmem:[#allocation7 + $0x6c] ss:$16 sps:$4 sm:$0xff]   ;;  %v723_v19 = vld [vmem:[#allocation7 + $0x60] ss:$16 sps:$4 sm:$0xff]   ;;  %v724_v20 = vld [vmem:[#allocation7 + $0x68] ss:$16 sps:$4 sm:$0xff]  }
  0x3d   :  { %280 = vmatpush1.bf16.msra.mxu0 %v711_v11  ;;  %v725_v21 = vld [vmem:[#allocation7 + $0x84] ss:$16 sps:$4 sm:$0xff]   ;;  %v727_v22 = vld [vmem:[#allocation7 + $0x8c] ss:$16 sps:$4 sm:$0xff]   ;;  %v729_v23 = vld [vmem:[#allocation7 + $0x80] ss:$16 sps:$4 sm:$0xff]  }
  0x3e   :  { %323 = vmatpush1.bf16.msra.mxu1 %v712_v12  ;;  %281 = vmatprep.subr.bf16.mxu0 %v713_v13  ;;  %v730_v24 = vld [vmem:[#allocation7 + $0x88] ss:$16 sps:$4 sm:$0xff]   ;;  %v731_v25 = vld [vmem:[#allocation7 + $0xa4] ss:$16 sps:$4 sm:$0xff]   ;;  %v733_v26 = vld [vmem:[#allocation7 + $0xac] ss:$16 sps:$4 sm:$0xff]  }
  0x3f   :  { %324 = vmatprep.subr.bf16.mxu1 %v715_v14  ;;  %v735_v27 = vld [vmem:[#allocation7 + $0xa0] ss:$16 sps:$4 sm:$0xff]   ;;  %v736_v28 = vld [vmem:[#allocation7 + $0xa8] ss:$16 sps:$4 sm:$0xff]   ;;  %v737_v29 = vld [vmem:[#allocation7 + $0xc4] ss:$16 sps:$4 sm:$0xff]  }
  0x40   :  { %69 = vadd.xlane.f32.xlu0 %v66_v10  ;;  %v739_v30 = vld [vmem:[#allocation7 + $0xcc] ss:$16 sps:$4 sm:$0xff]   ;;  %v741_v31 = vld [vmem:[#allocation7 + $0xc0] ss:$16 sps:$4 sm:$0xff]   ;;  %v742_v32 = vld [vmem:[#allocation7 + $0xc8] ss:$16 sps:$4 sm:$0xff]  }
  0x41   :  { %282 = vmatpush1.bf16.msra.mxu0 %v717_v15  ;;  %v743_v33 = vld [vmem:[#allocation7 + $0xe4] ss:$16 sps:$4 sm:$0xff]   ;;  %v745_v34 = vld [vmem:[#allocation7 + $0xec] ss:$16 sps:$4 sm:$0xff]   ;;  %v747_v36 = vld [vmem:[#allocation7 + $0xe0] ss:$16 sps:$4 sm:$0xff]  }
  0x42   :  { %325 = vmatpush1.bf16.msra.mxu1 %v718_v16  ;;  %283 = vmatprep.subr.bf16.mxu0 %v719_v17  ;;  %v748_v37 = vld [vmem:[#allocation7 + $0xe8] ss:$16 sps:$4 sm:$0xff]   ;;  %v749_v49 = vld [vmem:[#allocation9 + $0x40] sm:$0xff]   ;;  %v753_v53 = vld [vmem:[#allocation9 + $0x50] sm:$0xff]   ;;  %s887_s2 = smov [#allocation10]  }
  0x43   :  { %326 = vmatprep.subr.bf16.mxu1 %v721_v18  ;;  %v750_v50 = vld [vmem:[#allocation9] sm:$0xff]   ;;  %v751_v51 = vld [vmem:[#allocation9 + $0x48] sm:$0xff]   ;;  %v754_v54 = vld [vmem:[#allocation9 + $0x10] sm:$0xff]   ;;  %s592_s23 = sshll.u32 %s887_s2, 4  ;;  %s593_s23 = int_to_ptr.vmem [resolvable:$true] %s592_s23 }
  0x44   :  { %v752_v52 = vld [vmem:[#allocation9 + $0x8] sm:$0xff]   ;;  %v755_v55 = vld [vmem:[#allocation9 + $0x58] sm:$0xff]   ;;  %v757_v57 = vld [vmem:[#allocation9 + $0x60] sm:$0xff]   ;;  %s851_s24 = scalar_lea.vmem %s593_s23, 128  ;;  %p856_p11 = scmp.lt.s32.totalorder %s593_s23, %s593_s23 }
  0x45   :  { %284 = vmatpush1.bf16.msra.mxu0 %v723_v19  ;;  %v756_v56 = vld [vmem:[#allocation9 + $0x18] sm:$0xff]   ;;  %v758_v58 = vld [vmem:[#allocation9 + $0x20] sm:$0xff]   ;;  %v759_v59 = vld [vmem:[#allocation9 + $0x68] sm:$0xff]   ;;  %p852_p10 = scmp.ne.s32.totalorder %s593_s23, %s851_s24  ;;  %p857_p12 = scmp.lt.s32.totalorder %s851_s24, %s851_s24 }
  0x46   :  { %327 = vmatpush1.bf16.msra.mxu1 %v724_v20  ;;  %285 = vmatprep.subr.bf16.mxu0 %v725_v21  ;;  %v760_v60 = vld [vmem:[#allocation9 + $0x28] sm:$0xff]   ;;  %v761_v61 = vld [vmem:[#allocation9 + $0x70] sm:$0xff]   ;;  %v763_v63 = vld [vmem:[#allocation9 + $0x78] sm:$0xff]  }
  0x47   :  { %328 = vmatprep.subr.bf16.mxu1 %v727_v22  ;;  %v762_v62 = vld [vmem:[#allocation9 + $0x30] sm:$0xff]   ;;  %v764_v0 = vld [vmem:[#allocation9 + $0x38] sm:$0xff]   ;;  %p858_p13 = por %p857_p12, %p856_p11 }
  0x49   :  { %286 = vmatpush1.bf16.msra.mxu0 %v729_v23  ;;  %p859_p0 = pnand %p858_p13, %p852_p10 }
  0x4a   :  { %329 = vmatpush1.bf16.msra.mxu1 %v730_v24  ;;  %287 = vmatprep.subr.bf16.mxu0 %v731_v25 }
  0x4b   :  { %330 = vmatprep.subr.bf16.mxu1 %v733_v26 }
  0x4d   :  { %288 = vmatpush1.bf16.msra.mxu0 %v735_v27 }
  0x4e   :  { %331 = vmatpush1.bf16.msra.mxu1 %v736_v28  ;;  %289 = vmatprep.subr.bf16.mxu0 %v737_v29 }
  0x4f   :  { %332 = vmatprep.subr.bf16.mxu1 %v739_v30 }
  0x51   :  { %290 = vmatpush1.bf16.msra.mxu0 %v741_v31 }
  0x52   :  { %333 = vmatpush1.bf16.msra.mxu1 %v742_v32  ;;  %291 = vmatprep.subr.bf16.mxu0 %v743_v33 }
  0x53   :  { %334 = vmatprep.subr.bf16.mxu1 %v745_v34 }
  0x55   :  { %292 = vmatpush1.bf16.msra.mxu0 %v747_v36 }
  0x56   :  { %335 = vmatpush1.bf16.msra.mxu1 %v748_v37  ;;  %670 = vmatprep.subr.bf16.mxu0 %v749_v49 }
  0xc9   :  { %v68_v38 = vpop.xlane.xlu0 %67 }
  0xca   :  { %v72_v39 = vmul.f32 0.0078125, %v68_v38 }
  0xcc   :  { %v74_v40 = vadd.f32 1e-06, %v72_v39 }
  0xcd   :  { %v70_v41 = vpop.xlane.xlu0 %69 }
  0xce   :  { %v73_v42 = vmul.f32 0.0078125, %v70_v41  ;;  %765 = vrsqrt.f32 %v74_v40 }
  0xd0   :  { %v75_v43 = vadd.f32 1e-06, %v73_v42 }
  0xd2   :  { %767 = vrsqrt.f32 %v75_v43 }
  0xd8   :  { %v766_v44 = vpop.eup %765 }
  0xd9   :  { %v78_v46 = vmul.f32 %v766_v44, %v950_v1 }
  0xdc   :  { %v768_v45 = vpop.eup %767 }
  0xdd   :  { %v79_v47 = vmul.f32 %v768_v45, %v952_v2 }
  0xdf   :  { %v80_v48 = vpack.c.bf16 %v79_v47, %v78_v46 }
  0xe1   :  { %310 = vmatmul.mubr.bf16.vlgmr.msra.gmra.mrb[0].mxu0 %v80_v48  ;;  %353 = vmatmul.mubr.bf16.vlgmr.msra.gmra.mrb[0].mxu1 %v80_v48 }
  0xe2   :  { %671 = vmatpush3.bf16.msra.mxu0 %v750_v50 }
  0xe3   :  { %672 = vmatprep.subr.bf16.mxu0 %v751_v51 }
  0xe6   :  { %673 = vmatpush3.bf16.msra.mxu0 %v752_v52 }
  0xe7   :  { %674 = vmatprep.subr.bf16.mxu0 %v753_v53 }
  0xea   :  { %675 = vmatpush3.bf16.msra.mxu0 %v754_v54 }
  0xeb   :  { %676 = vmatprep.subr.bf16.mxu0 %v755_v55 }
  0xee   :  { %677 = vmatpush3.bf16.msra.mxu0 %v756_v56 }
  0xef   :  { %678 = vmatprep.subr.bf16.mxu0 %v757_v57 }
  0xf2   :  { %679 = vmatpush3.bf16.msra.mxu0 %v758_v58 }
  0xf3   :  { %680 = vmatprep.subr.bf16.mxu0 %v759_v59 }
  0xf6   :  { %681 = vmatpush3.bf16.msra.mxu0 %v760_v60 }
  0xf7   :  { %682 = vmatprep.subr.bf16.mxu0 %v761_v61 }
  0xfa   :  { %683 = vmatpush3.bf16.msra.mxu0 %v762_v62 }
  0xfb   :  { %684 = vmatprep.subr.bf16.mxu0 %v763_v63 }
  0xfe   :  { %685 = vmatpush3.bf16.msra.mxu0 %v764_v0 }
 0x1b4   :  { %v311_v1 = vpop.f32.mrb[0].mxu0  ;;  %v354_v2 = vpop.f32.mrb[0].mxu1 }
 0x1b5   :  { %v637_v3 = vmul.f32 -1.442695, %v311_v1  ;;  %v313_v4 = vpop.f32.mrb[1].mxu0  ;;  %v356_v5 = vpop.f32.mrb[1].mxu1 }
 0x1b6   :  { %v638_v6 = vmul.f32 -1.442695, %v313_v4  ;;  %v315_v7 = vpop.f32.mrb[2].mxu0  ;;  %v358_v8 = vpop.f32.mrb[2].mxu1 }
 0x1b7   :  { %769 = vpow2.f32 %v637_v3  ;;  %v639_v9 = vmul.f32 -1.442695, %v315_v7  ;;  %v317_v10 = vpop.f32.mrb[3].mxu0  ;;  %v360_v11 = vpop.f32.mrb[3].mxu1 }
 0x1b8   :  { %771 = vpow2.f32 %v638_v6  ;;  %v640_v12 = vmul.f32 -1.442695, %v317_v10 }
 0x1b9   :  { %773 = vpow2.f32 %v639_v9 }
 0x1ba   :  { %775 = vpow2.f32 %v640_v12 }
 0x1c1   :  { %v770_v13 = vpop.eup %769 }
 0x1c2   :  { %v772_v14 = vpop.eup %771  ;;  %v375_v15 = vadd.f32 1.0, %v770_v13 }
 0x1c3   :  { %v774_v16 = vpop.eup %773  ;;  %v376_v17 = vadd.f32 1.0, %v772_v14 }
 0x1c4   :  { %v776_v18 = vpop.eup %775  ;;  %777 = vrcp.f32 %v375_v15  ;;  %v377_v19 = vadd.f32 1.0, %v774_v16 }
 0x1c5   :  { %779 = vrcp.f32 %v376_v17  ;;  %v378_v20 = vadd.f32 1.0, %v776_v18 }
 0x1c6   :  { %781 = vrcp.f32 %v377_v19 }
 0x1c7   :  { %783 = vrcp.f32 %v378_v20 }
 0x1ce   :  { %v778_v21 = vpop.eup %777 }
 0x1cf   :  { %v780_v22 = vpop.eup %779  ;;  %v387_v23 = vmul.f32 %v778_v21, %v311_v1 }
 0x1d0   :  { %v782_v24 = vpop.eup %781  ;;  %v388_v25 = vmul.f32 %v780_v22, %v313_v4 }
 0x1d1   :  { %v784_v26 = vpop.eup %783  ;;  %v391_v27 = vmul.f32 %v387_v23, %v354_v2  ;;  %v389_v28 = vmul.f32 %v782_v24, %v315_v7 }
 0x1d2   :  { %v392_v29 = vmul.f32 %v388_v25, %v356_v5  ;;  %v390_v30 = vmul.f32 %v784_v26, %v317_v10 }
 0x1d3   :  { %v393_v31 = vmul.f32 %v389_v28, %v358_v8 }
 0x1d4   :  { %v394_v32 = vmul.f32 %v390_v30, %v360_v11 }
 0x1d5   :  { %v397_v33 = vpack.c.bf16 %v393_v31, %v391_v27 }
 0x1d6   :  { %v398_v34 = vpack.c.bf16 %v394_v32, %v392_v29 }
 0x1d8   :  { %559 = vmatprep.mubr.bf16.mxu0 %v398_v34 }
 0x1d9   :  { %560 = vmatmul.mubr.bf16.vlgmr.msra.gmra.mrb[4].mxu0 %v397_v33 }
 0x2ac   :  { %v686_v35 = vpop.f32.mrb[4].mxu0 }
 0x2ad   :  { %v687_v36 = vpop.f32.mrb[5].mxu0 }
 0x2ae   :  { %v688_v37 = vadd.f32 %v687_v36, %v686_v35  ;;  %v689_v38 = vpop.f32.mrb[6].mxu0 }
 0x2af   :  { %v690_v39 = vpop.f32.mrb[7].mxu0 }
 0x2b0   :  { %v691_v40 = vadd.f32 %v690_v39, %v689_v38 }
 0x2b2   :  { %v668_v41 = vpack.c.bf16 %v691_v40, %v688_v37 }
 0x2b4   :  { %669 = vst [vmem:[#allocation10] sm:$0xff] %v668_v41  }
 0x2b5   :  { %862 = shalt.err (!%p859_p0)
}
 0x2b6   :  { %s863_s27 = scalar_lea.hbm %s978_s3, 128 }
 0x2b7   :  { %p864_p1 = scmp.ne.s32.totalorder %s978_s3, %s863_s27  ;;  %p867_p2 = scmp.lt.u32.totalorder %s863_s27, %s978_s3 }
 0x2b9   :  { %p869_p3 = pnand %p867_p2, %p864_p1 }
 0x2bb   :  { %872 = shalt.err (!%p869_p3)
}
 0x2bc   :  { %598 = dma.vmem_to_hbm [thread:$0]  %s593_s23, 128, %s978_s3, [#allocation6], %s883_s1, %s883_s1, %s884_s9  }
 0x2bd   :  { %877 = dma.done.wait [#allocation6], 128  }
 0x2be   :  { %878 = vsyncadd [#allocation6], 4294967168 }
 0x2bf   :  { %602 = vsyncpa [#allocation5], 1 }
 0x2c0   :  { %603 = vsyncpa [#allocation8], 1 }
 0x2c1   :  { %604 = vsyncpa [#allocation6], 1 }

</bundles_post_ra>
